<compile_context>
chip_gen: v5e
topology: v5e:2x2
jax: 0.10.0
libtpu: 0.0.40
codegen_flags: <defaults>
</compile_context>

<pallas_src>
import functools

import jax
import jax.numpy as jnp
from jax.experimental import pallas as pl
from jax.experimental.pallas import tpu as pltpu

_LANES = 128     # lane width
_SUBLANES = 8    # f32 sublane granularity


def _cdiv(a, b):
    return (a + b - 1) // b


def _round_up(a, b):
    return ((a + b - 1) // b) * b


def _linear_kernel(wb_ref, x_ref, o_ref):
    # wb_ref: (4,) f32 in SMEM -> [w0, w1, w2, b]
    # x_ref : (3, TR, 128) f32 in VMEM (feature, sublane-row, lane)
    # o_ref : (TR, 128) f32 in VMEM (dense output slab, unmasked stores)
    w0 = wb_ref[0]
    w1 = wb_ref[1]
    w2 = wb_ref[2]
    b = wb_ref[3]
    # Three VPU multiply-adds per output element over dense (TR, 128) slabs.
    y = w0 * x_ref[0] + w1 * x_ref[1] + w2 * x_ref[2] + b
    o_ref[...] = y.astype(o_ref.dtype)


@functools.partial(jax.jit, static_argnames=("max_tile_rows",))
def multivariate_linear_regression(x, weight, bias, *, max_tile_rows=2048):
    """Forward of nn.Linear(3, 1): y = x @ W^T + b.

    x: (N, 3) f32, weight: (1, 3) f32, bias: (1,) f32. Returns (N, 1) f32.

    max_tile_rows: rows of 128 samples per grid step (multiple of 8). The
    default (2048 rows = 256K samples) keeps double-buffered in+out VMEM at
    ~8 MiB, comfortable on every generation.
    """
    n = x.shape[0]

    # --- choose tiling in sublane-rows (128 samples per row) -------------
    rows = _cdiv(n, _LANES)                       # rows of real data
    # >= 2 grid steps when there is more than one sublane block of data so
    # the "parallel" axis can use both v7x TensorCores; otherwise 1 step.
    min_steps = 2 if rows > _SUBLANES else 1
    steps = max(_cdiv(rows, max_tile_rows), min_steps)
    tile_rows = _round_up(_cdiv(rows, steps), _SUBLANES)
    rows_pad = steps * tile_rows                  # only the last tile is padded
    n_pad = rows_pad * _LANES

    # --- layout glue (fused into one HBM pass by the enclosing jit) ------
    x_t = jnp.transpose(x)                        # (3, N) feature-major
    if n_pad != n:
        x_t = jnp.pad(x_t, ((0, 0), (0, n_pad - n)))
    x_b = x_t.reshape(3, rows_pad, _LANES)        # sublane-dense slabs

    # Pack weight and bias into a single SMEM scalar vector.
    wb = jnp.concatenate(
        [weight.reshape(3), bias.reshape(1)]).astype(jnp.float32)

    out = pl.pallas_call(
        _linear_kernel,
        out_shape=jax.ShapeDtypeStruct((rows_pad, _LANES), x.dtype),
        grid=(steps,),
        in_specs=[
            pl.BlockSpec(memory_space=pltpu.MemorySpace.SMEM),   # wb (4,)
            pl.BlockSpec((3, tile_rows, _LANES), lambda i: (0, i, 0)),
        ],
        out_specs=pl.BlockSpec((tile_rows, _LANES), lambda i: (i, 0)),
        compiler_params=pltpu.CompilerParams(
            dimension_semantics=("parallel",),     # shard tiles across TCs
            vmem_limit_bytes=32 * 1024 * 1024,     # explicit budget + headroom
        ),
        cost_estimate=pl.CostEstimate(
            flops=6 * n_pad, transcendentals=0, bytes_accessed=16 * n_pad),
    )(wb, x_b)

    # Undo layout glue: (rows_pad, 128) -> (N, 1). Padded lanes (== bias) are
    # discarded by the slice.
    return out.reshape(n_pad)[:n].reshape(n, 1)


if __name__ == "__main__":
    key = jax.random.PRNGKey(0)
    kx, kw, kb, kx2 = jax.random.split(key, 4)

    # nn.Linear(3, 1) parameters (torch-default-style uniform init bounds).
    bound = 1.0 / jnp.sqrt(3.0)
    weight = jax.random.uniform(kw, (1, 3), dtype=jnp.float32,
                                minval=-bound, maxval=bound)
    bias = jax.random.uniform(kb, (1,), dtype=jnp.float32,
                              minval=-bound, maxval=bound)

    # Test 1: small batch, single-tile grid.
    N = 8
    x = jax.random.normal(kx, (N, 3), dtype=jnp.float32)
    y = jax.block_until_ready(multivariate_linear_regression(x, weight, bias))
    y_ref = x @ weight.T + bias
    assert y.shape == (N, 1), y.shape
    assert jnp.allclose(y, y_ref, atol=1e-5, rtol=1e-5), (y, y_ref)

    # Test 2: non-multiple-of-128 batch with a small tile cap so the grid has
    # several steps (exercises sublane-dense tiling, ragged tail, parallel axis).
    N2 = 3000
    x2 = jax.random.normal(kx2, (N2, 3), dtype=jnp.float32)
    y2 = jax.block_until_ready(
        multivariate_linear_regression(x2, weight, bias, max_tile_rows=8))
    y2_ref = x2 @ weight.T + bias
    assert y2.shape == (N2, 1), y2.shape
    assert jnp.allclose(y2, y2_ref, atol=1e-5, rtol=1e-5), (y2, y2_ref)

    print("KERNEL_OK")
</pallas_src>

<mosaic_0001>
module attributes {stable_mosaic.version = 11 : i64} {
  func.func @_linear_kernel(%arg0: i32, %arg1: memref<4xf32, #tpu.memory_space<smem>>, %arg2: memref<3x8x128xf32, #tpu.memory_space<vmem>>, %arg3: memref<8x128xf32, #tpu.memory_space<vmem>>) attributes {dimension_semantics = [#tpu.dimension_semantics<parallel>], iteration_bounds = array<i64: 1>, scalar_prefetch = 0 : i64, scratch_operands = 0 : i64, tpu.core_type = #tpu.core_type<tc>, window_params = [{transform_indices = @transform_0, window_bounds = array<i64: 4>}, {transform_indices = @transform_1, window_bounds = array<i64: 3, 8, 128>}, {transform_indices = @transform_2, window_bounds = array<i64: 8, 128>}]} {
    %c0 = arith.constant 0 : index
    %0 = memref.load %arg1[%c0] : memref<4xf32, #tpu.memory_space<smem>>
    %c1 = arith.constant 1 : index
    %1 = memref.load %arg1[%c1] : memref<4xf32, #tpu.memory_space<smem>>
    %c2 = arith.constant 2 : index
    %2 = memref.load %arg1[%c2] : memref<4xf32, #tpu.memory_space<smem>>
    %c3 = arith.constant 3 : index
    %3 = memref.load %arg1[%c3] : memref<4xf32, #tpu.memory_space<smem>>
    %c0_0 = arith.constant 0 : index
    %c0_1 = arith.constant 0 : index
    %c0_2 = arith.constant 0 : index
    %4 = vector.load %arg2[%c0_0, %c0_1, %c0_2] : memref<3x8x128xf32, #tpu.memory_space<vmem>>, vector<1x8x128xf32>
    %5 = vector.shape_cast %4 : vector<1x8x128xf32> to vector<8x128xf32>
    %6 = vector.broadcast %0 : f32 to vector<8x128xf32>
    %7 = arith.mulf %6, %5 : vector<8x128xf32>
    %c1_3 = arith.constant 1 : index
    %c0_4 = arith.constant 0 : index
    %c0_5 = arith.constant 0 : index
    %8 = vector.load %arg2[%c1_3, %c0_4, %c0_5] : memref<3x8x128xf32, #tpu.memory_space<vmem>>, vector<1x8x128xf32>
    %9 = vector.shape_cast %8 : vector<1x8x128xf32> to vector<8x128xf32>
    %10 = vector.broadcast %1 : f32 to vector<8x128xf32>
    %11 = arith.mulf %10, %9 : vector<8x128xf32>
    %12 = arith.addf %7, %11 : vector<8x128xf32>
    %c2_6 = arith.constant 2 : index
    %c0_7 = arith.constant 0 : index
    %c0_8 = arith.constant 0 : index
    %13 = vector.load %arg2[%c2_6, %c0_7, %c0_8] : memref<3x8x128xf32, #tpu.memory_space<vmem>>, vector<1x8x128xf32>
    %14 = vector.shape_cast %13 : vector<1x8x128xf32> to vector<8x128xf32>
    %15 = vector.broadcast %2 : f32 to vector<8x128xf32>
    %16 = arith.mulf %15, %14 : vector<8x128xf32>
    %17 = arith.addf %12, %16 : vector<8x128xf32>
    %18 = vector.broadcast %3 : f32 to vector<8x128xf32>
    %19 = arith.addf %17, %18 : vector<8x128xf32>
    %c0_9 = arith.constant 0 : index
    %c0_10 = arith.constant 0 : index
    %20 = vector.load %arg3[%c0_9, %c0_10] : memref<8x128xf32, #tpu.memory_space<vmem>>, vector<8x128xf32>
    tpu.vector_store %arg3[%c0_9, %c0_10], %19 {strides = array<i32>} : memref<8x128xf32, #tpu.memory_space<vmem>>, vector<8x128xf32>,
    return
  }
  func.func @transform_0(%arg0: i32) -> i32 {
    %c0_i32 = arith.constant 0 : i32
    %c0_i32_0 = arith.constant 0 : i32
    return %c0_i32 : i32
  }
  func.func @transform_1(%arg0: i32) -> (i32, i32, i32) {
    %c0_i32 = arith.constant 0 : i32
    %c0_i32_0 = arith.constant 0 : i32
    %c0_i32_1 = arith.constant 0 : i32
    return %c0_i32, %arg0, %c0_i32_0 : i32, i32, i32
  }
  func.func @transform_2(%arg0: i32) -> (i32, i32) {
    %c0_i32 = arith.constant 0 : i32
    %c0_i32_0 = arith.constant 0 : i32
    return %arg0, %c0_i32 : i32, i32
  }
}

</mosaic_0001>

<bundles_post_ra>
// kernel: multivariate_linear_regression.1
= control target key start
LH: loop header
LB: loop body
LE: loop exit
PB: predicated region body
PF: predicated region fallthrough
CT: control target
= control target key end

     0   :  { %7 = vsyncpa [#allocation3], 0  ;;  %s69_s12 = smov [#allocation2]   ;;  %s100_s0 = inlined_call_operand.vmem [shape: f32[4], index: 0, kind: input, shape index: {}]   ;;  %s101_s1 = inlined_call_operand.vmem [shape: f32[3,8,128], index: 1, kind: input, shape index: {}]   ;;  %s102_s2 = inlined_call_operand.vmem [shape: f32[8,128], index: 2, kind: output, shape index: {}]  }
   0x1   :  { %s13_s11 = sshll.u32 %s100_s0, 4  ;;  %s14_s11 = int_to_ptr.vmem [resolvable:$true] %s13_s11 }
   0x2   :  { %16 = dma.vmem_to_smem %s14_s11, 16, %s69_s12, [#allocation3]  }
   0x3   :  { %67 = dma.done.wait [#allocation3], 16  }
   0x4   :  { %68 = vsyncadd [#allocation3], 4294967280 }
   0x5   :  { %23 = sfence }
   0x6   :  { %s24_s13 = sld [smem:[#allocation2]]  ;;  %v28_v0 = vld [vmem:[%s101_s1] sm:$0xff]  ;;  %v52_v1 = vld [vmem:[%s101_s1 + $0x8] sm:$0xff]  ;;  %v53_v3 = vld [vmem:[%s101_s1 + $0x10] sm:$0xff] }
   0x7   :  { %s49_s14 = sld [smem:[#allocation2 + $0x1]] }
   0x8   :  { %s50_s15 = sld [smem:[#allocation2 + $0x2]] }
   0x9   :  { %s51_s16 = sld [smem:[#allocation2 + $0x3]] }
   0xc   :  { %v29_v2 = vstv %s24_s13 }
   0xd   :  { %v30_v4 = vmul.f32 %v29_v2, %v28_v0  ;;  %v33_v5 = vstv %s49_s14 }
   0xe   :  { %v34_v6 = vmul.f32 %v52_v1, %v33_v5  ;;  %v38_v7 = vstv %s50_s15 }
   0xf   :  { %v39_v8 = vmul.f32 %v53_v3, %v38_v7  ;;  %v41_v10 = vstv %s51_s16 }
  0x10   :  { %v35_v9 = vadd.f32 %v34_v6, %v30_v4 }
  0x12   :  { %v40_v11 = vadd.f32 %v39_v8, %v35_v9 }
  0x14   :  { %v42_v12 = vadd.f32 %v41_v10, %v40_v11 }
  0x16   :  { %43 = vst [vmem:[%s102_s2] sm:$0xff] %v42_v12 }
  0x17   :  { %48 = vsyncpa [#allocation3], 1 }

</bundles_post_ra>
